<compile_context>
chip_gen: v7x
topology: tpu7x:2x2x1
jax: 0.10.0
libtpu: 0.0.40
codegen_flags: <defaults>
</compile_context>

<pallas_src>
import functools

import jax
import jax.numpy as jnp
from jax.experimental import pallas as pl
from jax.experimental.pallas import tpu as pltpu


# ----------------------------------------------------------------------------
# Kernels
# ----------------------------------------------------------------------------
def _linear_kernel_f32(x_ref, wt_ref, b_ref, o_ref):
    """f32 output: accumulate directly into o_ref (no scratch, no finalize)."""
    k = pl.program_id(2)

    @pl.when(k == 0)
    def _init():
        # Seed the resident output block with the bias once.
        o_ref[...] = jnp.broadcast_to(b_ref[...], o_ref.shape)

    o_ref[...] += jnp.dot(
        x_ref[...], wt_ref[...], preferred_element_type=jnp.float32
    )


def _linear_kernel_acc(x_ref, wt_ref, b_ref, o_ref, acc_ref):
    """Narrow output dtypes: f32 VMEM accumulator, cast on the last K step."""
    k = pl.program_id(2)

    @pl.when(k == 0)
    def _init():
        acc_ref[...] = jnp.broadcast_to(b_ref[...], acc_ref.shape)

    acc_ref[...] += jnp.dot(
        x_ref[...], wt_ref[...], preferred_element_type=jnp.float32
    )

    @pl.when(k == pl.num_programs(2) - 1)
    def _finalize():
        o_ref[...] = acc_ref[...].astype(o_ref.dtype)


# ----------------------------------------------------------------------------
# Helpers
# ----------------------------------------------------------------------------
def _round_up(x, m):
    return ((x + m - 1) // m) * m


def _sublane_align(dtype):
    itemsize = jnp.dtype(dtype).itemsize
    return {4: 8, 2: 16, 1: 32}.get(itemsize, 8)


def _pick_tile(dim_pad, align, cap):
    """Largest multiple-of-`align` tile <= cap that divides dim_pad."""
    t = min(cap, dim_pad)
    t = (t // align) * align
    while dim_pad % t != 0:
        t -= align
    return t


# ----------------------------------------------------------------------------
# Parameter prep (do ONCE per set of weights, not per forward call)
# ----------------------------------------------------------------------------
def prepare_linear_params(weight, bias, *, dtype=None):
    """Pre-transpose and pad nn.Linear params for the Pallas kernel.

    weight: [out_dim, in_dim], bias: [out_dim].
    Returns (w_t_padded [K_pad, N_pad], bias_padded_f32 [1, N_pad]).
    """
    out_dim, in_dim = weight.shape
    if dtype is not None:
        weight = weight.astype(dtype)
    k_pad = _round_up(in_dim, 128)
    n_pad = _round_up(out_dim, 128)
    w_t = jnp.pad(weight.T, ((0, k_pad - in_dim), (0, n_pad - out_dim)))
    b_p = jnp.pad(bias.astype(jnp.float32), (0, n_pad - out_dim)).reshape(1, n_pad)
    return w_t, b_p


# ----------------------------------------------------------------------------
# Forward
# ----------------------------------------------------------------------------
def linear_forward_prepared(x, w_t_padded, b_padded, out_dim,
                            *, tm=None, tn=None, tk=None):
    """y = x @ W^T + b using pre-padded [K_pad, N_pad] W^T and f32 bias."""
    batch, in_dim = x.shape
    k_pad, n_pad = w_t_padded.shape
    assert b_padded.shape == (1, n_pad)
    assert in_dim <= k_pad
    dtype = x.dtype
    assert w_t_padded.dtype == dtype, "x and prepared weight dtypes must match"

    m_align = _sublane_align(dtype)
    m_pad = _round_up(batch, m_align)

    # --- tile selection: divisors of the (minimally) padded dims -------------
    explicit_tn = tn is not None
    if tm is None:
        tm = _pick_tile(m_pad, m_align, 512)
    if tk is None:
        tk = _pick_tile(k_pad, 128, 512)
    if tn is None:
        tn = _pick_tile(n_pad, 128, 1024)
    assert m_pad % tm == 0 and tm % m_align == 0, "tm must divide padded M"
    assert k_pad % tk == 0 and tk % 128 == 0, "tk must divide padded K (x128)"
    assert n_pad % tn == 0 and tn % 128 == 0, "tn must divide padded N (x128)"

    # v7x has 2 TensorCores; make sure the parallel (M, N) grid has >= 2
    # blocks for small-batch shapes so one core is not idle.
    if not explicit_tn:
        while (m_pad // tm) * (n_pad // tn) < 2 and tn >= 256 and tn % 256 == 0:
            tn //= 2

    # Zero-padded K columns and padded bias entries contribute nothing, so the
    # slice-back below is exact.
    x_p = jnp.pad(x, ((0, m_pad - batch), (0, k_pad - in_dim)))

    grid = (m_pad // tm, n_pad // tn, k_pad // tk)
    out_is_f32 = dtype == jnp.float32

    itemsize = jnp.dtype(dtype).itemsize
    cost = pl.CostEstimate(
        flops=2 * m_pad * n_pad * k_pad,
        transcendentals=0,
        bytes_accessed=itemsize * (m_pad * k_pad + k_pad * n_pad + m_pad * n_pad)
        + 4 * n_pad,
    )

    in_specs = [
        pl.BlockSpec((tm, tk), lambda i, j, k: (i, k)),   # x
        pl.BlockSpec((tk, tn), lambda i, j, k: (k, j)),   # W^T (dominant stream)
        pl.BlockSpec((1, tn), lambda i, j, k: (0, j)),    # bias (f32)
    ]
    out_spec = pl.BlockSpec((tm, tn), lambda i, j, k: (i, j))

    if out_is_f32:
        kernel = _linear_kernel_f32
        scratch = []
    else:
        kernel = _linear_kernel_acc
        scratch = [pltpu.VMEM((tm, tn), jnp.float32)]

    out_padded = pl.pallas_call(
        kernel,
        out_shape=jax.ShapeDtypeStruct((m_pad, n_pad), dtype),
        grid_spec=pltpu.PrefetchScalarGridSpec(
            num_scalar_prefetch=0,
            grid=grid,
            in_specs=in_specs,
            out_specs=out_spec,
            scratch_shapes=scratch,
        ),
        compiler_params=pltpu.CompilerParams(
            dimension_semantics=("parallel", "parallel", "arbitrary"),
            vmem_limit_bytes=32 * 1024 * 1024,
        ),
        cost_estimate=cost,
    )(x_p, w_t_padded, b_padded)

    return out_padded[:batch, :out_dim]


def linear_forward(x, weight, bias, *, tm=None, tn=None, tk=None):
    """One-shot convenience wrapper (prep + forward). In a real model, call
    prepare_linear_params() once and reuse the prepared weights."""
    out_dim = weight.shape[0]
    w_t, b_p = prepare_linear_params(weight, bias, dtype=x.dtype)
    return linear_forward_prepared(x, w_t, b_p, out_dim, tm=tm, tn=tn, tk=tk)


# ----------------------------------------------------------------------------
# Demo / self-test
# ----------------------------------------------------------------------------
if __name__ == "__main__":
    key = jax.random.PRNGKey(0)

    # --- Case 1: small shapes consistent with LinearRegreesionModel ---------
    batch, input_dim, output_dim = 8, 16, 4
    kx, kw, kb, key = jax.random.split(key, 4)
    x = jax.random.normal(kx, (batch, input_dim), dtype=jnp.float32)
    bound = 1.0 / (input_dim ** 0.5)
    weight = jax.random.uniform(
        kw, (output_dim, input_dim), dtype=jnp.float32, minval=-bound, maxval=bound
    )
    bias = jax.random.uniform(
        kb, (output_dim,), dtype=jnp.float32, minval=-bound, maxval=bound
    )

    w_t, b_p = prepare_linear_params(weight, bias)          # once per params
    out = linear_forward_prepared(x, w_t, b_p, output_dim)  # per forward
    jax.block_until_ready(out)
    ref = x @ weight.T + bias
    assert out.shape == (batch, output_dim)
    assert jnp.allclose(out, ref, atol=1e-5, rtol=1e-5)

    # --- Case 2: multi-tile grid + non-128 out_dim (padding path), f32 ------
    b2, i2, o2 = 192, 384, 200
    kx2, kw2, kb2, key = jax.random.split(key, 4)
    x2 = jax.random.normal(kx2, (b2, i2), dtype=jnp.float32)
    w2 = jax.random.normal(kw2, (o2, i2), dtype=jnp.float32) * 0.05
    bz2 = jax.random.normal(kb2, (o2,), dtype=jnp.float32) * 0.05

    w_t2, b_p2 = prepare_linear_params(w2, bz2)
    out2 = linear_forward_prepared(x2, w_t2, b_p2, o2, tm=64, tn=128, tk=128)
    jax.block_until_ready(out2)
    ref2 = x2 @ w2.T + bz2
    assert out2.shape == (b2, o2)
    assert jnp.allclose(out2, ref2, atol=1e-4, rtol=1e-4)

    # --- Case 3: bf16 operands, f32 accumulation (narrow-dtype kernel) ------
    b3, i3, o3 = 32, 384, 256
    kx3, kw3, kb3, key = jax.random.split(key, 4)
    x3 = jax.random.normal(kx3, (b3, i3), dtype=jnp.float32).astype(jnp.bfloat16)
    w3 = (jax.random.normal(kw3, (o3, i3), dtype=jnp.float32) * 0.05).astype(
        jnp.bfloat16
    )
    bz3 = jax.random.normal(kb3, (o3,), dtype=jnp.float32) * 0.05

    w_t3, b_p3 = prepare_linear_params(w3, bz3, dtype=jnp.bfloat16)
    out3 = linear_forward_prepared(x3, w_t3, b_p3, o3)
    jax.block_until_ready(out3)
    ref3 = (
        x3.astype(jnp.float32) @ w3.astype(jnp.float32).T + bz3
    ).astype(jnp.bfloat16)
    assert out3.shape == (b3, o3)
    assert jnp.allclose(
        out3.astype(jnp.float32), ref3.astype(jnp.float32), atol=1e-2, rtol=2e-2
    )

    print("KERNEL_OK")
</pallas_src>

<mosaic_0001>
module attributes {stable_mosaic.version = 11 : i64} {
  func.func @_linear_kernel_f32(%arg0: i32, %arg1: i32, %arg2: i32, %arg3: memref<8x128xf32, #tpu.memory_space<vmem>>, %arg4: memref<128x128xf32, #tpu.memory_space<vmem>>, %arg5: memref<1x128xf32, #tpu.memory_space<vmem>>, %arg6: memref<8x128xf32, #tpu.memory_space<vmem>>) attributes {dimension_semantics = [#tpu.dimension_semantics<parallel>, #tpu.dimension_semantics<parallel>, #tpu.dimension_semantics<arbitrary>], iteration_bounds = array<i64: 1, 1, 1>, scalar_prefetch = 0 : i64, scratch_operands = 0 : i64, tpu.core_type = #tpu.core_type<tc>, window_params = [{transform_indices = @transform_0, window_bounds = array<i64: 8, 128>}, {transform_indices = @transform_1, window_bounds = array<i64: 128, 128>}, {transform_indices = @transform_2, window_bounds = array<i64: 1, 128>}, {transform_indices = @transform_3, window_bounds = array<i64: 8, 128>}]} {
    %c0_i32 = arith.constant 0 : i32
    %0 = arith.cmpi eq, %arg2, %c0_i32 : i32
    %1 = arith.extui %0 : i1 to i32
    %c0_i32_0 = arith.constant 0 : i32
    %2 = arith.cmpi ne, %1, %c0_i32_0 : i32
    scf.if %2 {
      %c0_8 = arith.constant 0 : index
      %c0_9 = arith.constant 0 : index
      %9 = vector.load %arg5[%c0_8, %c0_9] : memref<1x128xf32, #tpu.memory_space<vmem>>, vector<1x128xf32>
      %10 = vector.shape_cast %9 : vector<1x128xf32> to vector<1x128xf32>
      %11 = vector.broadcast %10 : vector<1x128xf32> to vector<8x128xf32>
      %c0_10 = arith.constant 0 : index
      %c0_11 = arith.constant 0 : index
      %12 = vector.load %arg6[%c0_10, %c0_11] : memref<8x128xf32, #tpu.memory_space<vmem>>, vector<8x128xf32>
      tpu.vector_store %arg6[%c0_10, %c0_11], %11 {strides = array<i32>} : memref<8x128xf32, #tpu.memory_space<vmem>>, vector<8x128xf32>,
    } else {
    }
    %c0 = arith.constant 0 : index
    %c0_1 = arith.constant 0 : index
    %3 = vector.load %arg6[%c0, %c0_1] : memref<8x128xf32, #tpu.memory_space<vmem>>, vector<8x128xf32>
    %c0_2 = arith.constant 0 : index
    %c0_3 = arith.constant 0 : index
    %4 = vector.load %arg3[%c0_2, %c0_3] : memref<8x128xf32, #tpu.memory_space<vmem>>, vector<8x128xf32>
    %c0_4 = arith.constant 0 : index
    %c0_5 = arith.constant 0 : index
    %5 = vector.load %arg4[%c0_4, %c0_5] : memref<128x128xf32, #tpu.memory_space<vmem>>, vector<128x128xf32>
    %cst = arith.constant dense<0.000000e+00> : vector<8x128xf32>
    %6 = tpu.matmul %4, %5, %cst {dimension_numbers = #tpu.dot_dimension_numbers<[1], [0], [0], [1], [0, 0, 1, 1], [], []>} : vector<8x128xf32>, vector<128x128xf32>, vector<8x128xf32> -> vector<8x128xf32>
    %7 = arith.addf %3, %6 : vector<8x128xf32>
    %c0_6 = arith.constant 0 : index
    %c0_7 = arith.constant 0 : index
    %8 = vector.load %arg6[%c0_6, %c0_7] : memref<8x128xf32, #tpu.memory_space<vmem>>, vector<8x128xf32>
    tpu.vector_store %arg6[%c0_6, %c0_7], %7 {strides = array<i32>} : memref<8x128xf32, #tpu.memory_space<vmem>>, vector<8x128xf32>,
    return
  }
  func.func @transform_0(%arg0: i32, %arg1: i32, %arg2: i32) -> (i32, i32) {
    %c0_i32 = arith.constant 0 : i32
    return %arg0, %arg2 : i32, i32
  }
  func.func @transform_1(%arg0: i32, %arg1: i32, %arg2: i32) -> (i32, i32) {
    %c0_i32 = arith.constant 0 : i32
    return %arg2, %arg1 : i32, i32
  }
  func.func @transform_2(%arg0: i32, %arg1: i32, %arg2: i32) -> (i32, i32) {
    %c0_i32 = arith.constant 0 : i32
    %c0_i32_0 = arith.constant 0 : i32
    return %c0_i32, %arg1 : i32, i32
  }
  func.func @transform_3(%arg0: i32, %arg1: i32, %arg2: i32) -> (i32, i32) {
    %c0_i32 = arith.constant 0 : i32
    return %arg0, %arg1 : i32, i32
  }
}

</mosaic_0001>

<bundles_post_ra>
// kernel: tpu_custom_call.1
= control target key start
LH: loop header
LB: loop body
LE: loop exit
PB: predicated region body
PF: predicated region fallthrough
CT: control target
= control target key end

     0   :  { %8 = vsyncpa [#allocation3], 0  ;;  %s390_s0 = inlined_call_operand.hbm [shape: f32[8,128], index: 0, kind: input, shape index: {}]   ;;  %s391_s1 = inlined_call_operand.hbm [shape: f32[128,128], index: 1, kind: input, shape index: {}]   ;;  %s392_s2 = inlined_call_operand.vmem [shape: f32[1,128], index: 2, kind: input, shape index: {}]   ;;  %s393_s3 = inlined_call_operand.hbm [shape: f32[8,128], index: 3, kind: output, shape index: {}]  }
   0x1   :  { %9 = vsyncpa [#allocation6], 0 }
   0x2   :  { %10 = vsyncpa [#allocation4], 0  ;;  %s316_s12 = smov [#allocation2]   ;;  %s317_s14 = smov [#allocation5]  }
   0x3   :  { %s17_s13 = sshll.u32 %s316_s12, 4  ;;  %s26_s15 = sshll.u32 %s317_s14, 4  ;;  %s18_s13 = int_to_ptr.vmem [resolvable:$true] %s17_s13  ;;  %s344_s15 = int_to_ptr.vmem [resolvable:$true] %s26_s15 }
   0x4   :  { %s244_s18 = scalar_lea.hbm %s390_s0, 128 }
   0x5   :  { %p245_p0 = scmp.ne.s32.totalorder %s390_s0, %s244_s18  ;;  %p248_p1 = scmp.lt.u32.totalorder %s244_s18, %s390_s0 }
   0x7   :  { %p250_p2 = pnand %p248_p1, %p245_p0 }
   0x9   :  { %253 = shalt.err (!%p250_p2)
}
   0xa   :  { %s254_s23 = scalar_lea.vmem %s18_s13, 128  ;;  %p259_p4 = scmp.lt.s32.totalorder %s18_s13, %s18_s13 }
   0xb   :  { %p255_p3 = scmp.ne.s32.totalorder %s18_s13, %s254_s23  ;;  %p260_p5 = scmp.lt.s32.totalorder %s254_s23, %s254_s23 }
   0xd   :  { %p261_p6 = por %p260_p5, %p259_p4 }
   0xf   :  { %p262_p7 = pnand %p261_p6, %p255_p3 }
  0x11   :  { %265 = shalt.err (!%p262_p7)
}
  0x12   :  { %20 = dma.hbm_to_vmem [thread:$0]  %s390_s0, 128, %s18_s13, [#allocation3]  }
  0x13   :  { %s266_s28 = scalar_lea.hbm %s391_s1, 2048 }
  0x14   :  { %p267_p8 = scmp.ne.s32.totalorder %s391_s1, %s266_s28  ;;  %p270_p9 = scmp.lt.u32.totalorder %s266_s28, %s391_s1 }
  0x16   :  { %p272_p10 = pnand %p270_p9, %p267_p8 }
  0x18   :  { %275 = shalt.err (!%p272_p10)
}
  0x19   :  { %s276_s6 = scalar_lea.vmem %s344_s15, 2048  ;;  %p281_p12 = scmp.lt.s32.totalorder %s344_s15, %s344_s15 }
  0x1a   :  { %p277_p11 = scmp.ne.s32.totalorder %s344_s15, %s276_s6  ;;  %p282_p13 = scmp.lt.s32.totalorder %s276_s6, %s276_s6 }
  0x1c   :  { %p283_p0 = por %p282_p13, %p281_p12 }
  0x1e   :  { %p284_p1 = pnand %p283_p0, %p277_p11 }
  0x20   :  { %287 = shalt.err (!%p284_p1)
}
  0x21   :  { %s318_s0 = smov 128   ;;  %s319_s7 = smov 8  }
  0x22   :  { %32 = dma.hbm_to_vmem [thread:$0]  %s391_s1, 2048, %s344_s15, [#allocation6], %s318_s0, %s318_s0, %s319_s7  }
  0x23   :  { %310 = dma.done.wait [#allocation3], 128  }
  0x24   :  { %311 = vsyncadd [#allocation3], 4294967168 }
  0x25   :  { %312 = dma.done.wait [#allocation6], 2048  }
  0x26   :  { %313 = vsyncadd [#allocation6], 4294965248  ;;  %v320_v0 = vmov 0.0|0.0   ;;  %vm321_vm0 = vmmov 0   ;;  %v322_v1 = vmov 0.0   ;;  %v55_v2 = vld [vmem:[#allocation5] sm:$0xff] }
  0x27   :  { %212 = vmatprep.subr.bf16.mxu0 %v320_v0  ;;  %209 = vmatprep.mubr.msk.f32.mxu0 %vm321_vm0, %v322_v1  ;;  %v56_v3 = vld [vmem:[#allocation5 + $0x8] sm:$0xff]  ;;  %v57_v4 = vld [vmem:[#allocation5 + $0x10] sm:$0xff]  ;;  %v58_v6 = vld [vmem:[#allocation5 + $0x18] sm:$0xff]  ;;  %s323_s11 = smov [#allocation7]  }
  0x28   :  { %v213_v5 = vpack.c.bf16 %v56_v3, %v55_v2  ;;  %v216_v7 = vpack.c.bf16 %v58_v6, %v57_v4  ;;  %v59_v8 = vld [vmem:[#allocation5 + $0x20] sm:$0xff]  ;;  %v60_v9 = vld [vmem:[#allocation5 + $0x28] sm:$0xff]  ;;  %v61_v11 = vld [vmem:[#allocation5 + $0x30] sm:$0xff]  ;;  %s149_s12 = sshll.u32 %s323_s11, 4  ;;  %s150_s12 = int_to_ptr.vmem [resolvable:$true] %s149_s12 }
  0x29   :  { %v219_v10 = vpack.c.bf16 %v60_v9, %v59_v8  ;;  %v62_v12 = vld [vmem:[#allocation5 + $0x38] sm:$0xff]  ;;  %v63_v14 = vld [vmem:[#allocation5 + $0x40] sm:$0xff]  ;;  %v64_v15 = vld [vmem:[#allocation5 + $0x48] sm:$0xff]  ;;  %s288_s13 = scalar_lea.vmem %s150_s12, 128  ;;  %p293_p3 = scmp.lt.s32.totalorder %s150_s12, %s150_s12 }
  0x2a   :  { %214 = vmatpush3.bf16.msra.mxu0 %v213_v5  ;;  %v222_v13 = vpack.c.bf16 %v62_v12, %v61_v11  ;;  %v225_v16 = vpack.c.bf16 %v64_v15, %v63_v14  ;;  %v65_v17 = vld [vmem:[#allocation5 + $0x50] sm:$0xff]  ;;  %v66_v18 = vld [vmem:[#allocation5 + $0x58] sm:$0xff]  ;;  %v67_v20 = vld [vmem:[#allocation5 + $0x60] sm:$0xff]  ;;  %p289_p2 = scmp.ne.s32.totalorder %s150_s12, %s288_s13  ;;  %p294_p4 = scmp.lt.s32.totalorder %s288_s13, %s288_s13 }
  0x2b   :  { %215 = vmatprep.subr.bf16.mxu0 %v320_v0  ;;  %v228_v19 = vpack.c.bf16 %v66_v18, %v65_v17  ;;  %v68_v21 = vld [vmem:[#allocation5 + $0x68] sm:$0xff]  ;;  %v69_v23 = vld [vmem:[#allocation5 + $0x70] sm:$0xff]  ;;  %v70_v24 = vld [vmem:[#allocation5 + $0x78] sm:$0xff] }
  0x2c   :  { %v231_v22 = vpack.c.bf16 %v68_v21, %v67_v20  ;;  %v234_v25 = vpack.c.bf16 %v70_v24, %v69_v23  ;;  %v54_v26 = vld [vmem:[#allocation2] sm:$0xff]  ;;  %p295_p5 = por %p294_p4, %p293_p3 }
  0x2d   :  { %v159_v27 = vld [vmem:[%s392_s2] ss:$0 sm:$0xff] }
  0x2e   :  { %217 = vmatpush3.bf16.msra.mxu0 %v216_v7  ;;  %p296_p6 = pnand %p295_p5, %p289_p2 }
  0x2f   :  { %218 = vmatprep.subr.bf16.mxu0 %v320_v0 }
  0x32   :  { %220 = vmatpush3.bf16.msra.mxu0 %v219_v10 }
  0x33   :  { %221 = vmatprep.subr.bf16.mxu0 %v320_v0 }
  0x36   :  { %223 = vmatpush3.bf16.msra.mxu0 %v222_v13 }
  0x37   :  { %224 = vmatprep.subr.bf16.mxu0 %v320_v0 }
  0x3a   :  { %226 = vmatpush3.bf16.msra.mxu0 %v225_v16 }
  0x3b   :  { %227 = vmatprep.subr.bf16.mxu0 %v320_v0 }
  0x3e   :  { %229 = vmatpush3.bf16.msra.mxu0 %v228_v19 }
  0x3f   :  { %230 = vmatprep.subr.bf16.mxu0 %v320_v0 }
  0x42   :  { %232 = vmatpush3.bf16.msra.mxu0 %v231_v22 }
  0x43   :  { %233 = vmatprep.subr.bf16.mxu0 %v320_v0 }
  0x46   :  { %235 = vmatpush3.bf16.msra.mxu0 %v234_v25 }
  0x49   :  { %210 = vmatmul.mubr.f32.vlgmr.msra.gmra.mrb[0].mxu0 %v54_v26 }
 0x11c   :  { %v137_v28 = vpop.f32.mrb[0].mxu0 }
 0x11d   :  { %v141_v29 = vadd.f32 %v159_v27, %v137_v28  ;;  %v211_v30 = vpop.f32.mrb[1].mxu0 }
 0x11f   :  { %142 = vst [vmem:[#allocation7] sm:$0xff] %v141_v29 }
 0x120   :  { %299 = shalt.err (!%p296_p6)
}
 0x121   :  { %s300_s16 = scalar_lea.hbm %s393_s3, 128 }
 0x122   :  { %p301_p7 = scmp.ne.s32.totalorder %s393_s3, %s300_s16  ;;  %p304_p8 = scmp.lt.u32.totalorder %s300_s16, %s393_s3 }
 0x124   :  { %p306_p9 = pnand %p304_p8, %p301_p7 }
 0x126   :  { %309 = shalt.err (!%p306_p9)
}
 0x127   :  { %152 = dma.vmem_to_hbm [thread:$0]  %s150_s12, 128, %s393_s3, [#allocation4]  }
 0x128   :  { %314 = dma.done.wait [#allocation4], 128  }
 0x129   :  { %315 = vsyncadd [#allocation4], 4294967168 }
 0x12a   :  { %156 = vsyncpa [#allocation3], 1 }
 0x12b   :  { %157 = vsyncpa [#allocation6], 1 }
 0x12c   :  { %158 = vsyncpa [#allocation4], 1 }

</bundles_post_ra>
